<compile_context>
chip_gen: v7x
topology: tpu7x:2x2x1
jax: 0.10.0
libtpu: 0.0.40
codegen_flags: <defaults>
</compile_context>

<pallas_src>
import math

import jax
import jax.numpy as jnp
from jax.experimental import pallas as pl
from jax.experimental.pallas import tpu as pltpu


# ---------------------------------------------------------------------------
# In-kernel exact GELU (erf via Abramowitz & Stegun 7.1.26, max err 1.5e-7).
# ---------------------------------------------------------------------------
_ERF_A1 = 0.254829592
_ERF_A2 = -0.284496736
_ERF_A3 = 1.421413741
_ERF_A4 = -1.453152027
_ERF_A5 = 1.061405429
_ERF_P = 0.3275911
_INV_SQRT2 = 0.7071067811865476


def _erf_approx(z):
    a = jnp.abs(z)
    den = 1.0 + _ERF_P * a
    # Reciprocal on the EUP slot (otherwise idle here) + one Newton-Raphson
    # refinement step -> ~f32-accurate 1/den without burning VALU ops.
    t = pl.reciprocal(den, approx=True)
    t = t * (2.0 - den * t)
    poly = t * (_ERF_A1 + t * (_ERF_A2 + t * (_ERF_A3 + t * (_ERF_A4 + t * _ERF_A5))))
    pos = 1.0 - poly * jnp.exp(-a * a)          # exp also lands on the EUP
    return jnp.where(z < 0.0, -pos, pos)


def _gelu_exact(x):
    return 0.5 * x * (1.0 + _erf_approx(x * _INV_SQRT2))


# ---------------------------------------------------------------------------
# Kernel: one (TM, Hp) row block of x, one (Hp, TF)/(TF, Hp) ffn tile of the
# weights, accumulating y in an f32 VMEM scratch across ffn tiles.
# ---------------------------------------------------------------------------
def ffn_kernel(x_ref, w1_ref, b1_ref, w2_ref, b2_ref, o_ref, acc_ref):
    f = pl.program_id(1)

    @pl.when(f == 0)
    def _init():
        acc_ref[...] = jnp.zeros_like(acc_ref)

    # (TM, Hp) @ (Hp, TF) -> (TM, TF), f32 accumulation on the MXU.
    h = jnp.dot(x_ref[...], w1_ref[...], preferred_element_type=jnp.float32)
    h = h + b1_ref[...]                       # bias + GELU stay in f32
    h = _gelu_exact(h)

    # (TM, TF) @ (TF, Hp) -> (TM, Hp), accumulated over ffn tiles.
    acc_ref[...] += jnp.dot(h.astype(w2_ref.dtype), w2_ref[...],
                            preferred_element_type=jnp.float32)

    @pl.when(f == pl.num_programs(1) - 1)
    def _finalize():
        o_ref[...] = (acc_ref[...] + b2_ref[...]).astype(o_ref.dtype)

    # TODO(synk): the module takes a dropout_rate but never applies dropout in
    # forward(); nothing to translate (eval-mode identity anyway).


def _round_up(x, m):
    return (x + m - 1) // m * m


def _ceil_div(a, b):
    return -(-a // b)


# ---------------------------------------------------------------------------
# One-time parameter preparation: pad weights to lane-aligned sizes (and
# optionally cast the matmul operands to bf16).  Do this once per model, NOT
# once per forward call.
# ---------------------------------------------------------------------------
def prepare_ffn_params(params, *, compute_dtype=jnp.float32, block_ffn=512):
    H, F = params["w1"].shape
    Hp = _round_up(H, 128)

    # Balance the ffn tiling: nf tiles of width TF (128-multiple; with the
    # 512 default TF comes out as a 256-multiple for real ffn sizes, matching
    # the v6e/v7x 256-wide MXU), padding F up to TF * nf.
    nf = max(1, _ceil_div(_round_up(F, 128), block_ffn))
    TF = _round_up(_ceil_div(F, nf), 128)
    Fp = TF * nf

    cdt = jnp.dtype(compute_dtype)
    w1 = jnp.pad(params["w1"], ((0, Hp - H), (0, Fp - F))).astype(cdt)
    w2 = jnp.pad(params["w2"], ((0, Fp - F), (0, Hp - H))).astype(cdt)
    # Biases stay f32: they are added to the f32 accumulators in-kernel.
    b1 = jnp.pad(params["b1"].reshape(1, F).astype(jnp.float32),
                 ((0, 0), (0, Fp - F)))
    b2 = jnp.pad(params["b2"].reshape(1, H).astype(jnp.float32),
                 ((0, 0), (0, Hp - H)))

    return {"w1": w1, "b1": b1, "w2": w2, "b2": b2,
            "H": H, "F": F, "Hp": Hp, "Fp": Fp, "TF": TF,
            "compute_dtype": cdt}


# ---------------------------------------------------------------------------
# Forward wrapper: flatten leading dims, pad rows / hidden, tile rows and ffn.
# ---------------------------------------------------------------------------
def feed_forward_network(x, prepared, *, block_rows=512):
    orig_shape = x.shape
    H = prepared["H"]
    Hp, Fp, TF = prepared["Hp"], prepared["Fp"], prepared["TF"]
    cdt = prepared["compute_dtype"]
    assert orig_shape[-1] == H, "last dim must equal hidden_size"

    M = int(math.prod(orig_shape[:-1]))
    x2 = x.reshape(M, H)

    # Row tiling: >= 2 blocks when possible (v7x has 2 TCs), balanced so the
    # last block is not mostly zero padding.
    n_row_blocks = max(1, _ceil_div(M, block_rows))
    if M > 8:
        n_row_blocks = max(n_row_blocks, 2)
    TM = _round_up(_ceil_div(M, n_row_blocks), 8)
    Mp = _round_up(M, TM)

    xp = jnp.pad(x2, ((0, Mp - M), (0, Hp - H))).astype(cdt)

    nf = Fp // TF
    grid = (Mp // TM, nf)
    out_dtype = x.dtype

    # Explicit scoped-VMEM budget (double-buffered in/out blocks + f32
    # accumulator + f32 intermediate), with 2x headroom, clamped to a level
    # that is safe on every chip (v7x physical VMEM is 64 MiB per TC).
    wb = cdt.itemsize
    ob = jnp.dtype(out_dtype).itemsize
    need = (2 * TM * Hp * wb                     # x blocks
            + 2 * (Hp * TF + TF * Hp) * wb       # w1 / w2 blocks
            + 2 * (TF + Hp) * 4                  # b1 / b2 blocks (f32)
            + 2 * TM * Hp * ob                   # output blocks
            + TM * Hp * 4                        # f32 accumulator scratch
            + TM * TF * 4)                       # f32 intermediate h
    vmem_limit = int(min(100 * 1024 * 1024, max(32 * 1024 * 1024, 2 * need)))

    out = pl.pallas_call(
        ffn_kernel,
        out_shape=jax.ShapeDtypeStruct((Mp, Hp), out_dtype),
        grid=grid,
        in_specs=[
            pl.BlockSpec((TM, Hp), lambda i, f: (i, 0)),   # x rows (const over f)
            pl.BlockSpec((Hp, TF), lambda i, f: (0, f)),   # w1 ffn tile
            pl.BlockSpec((1, TF), lambda i, f: (0, f)),    # b1 ffn tile
            pl.BlockSpec((TF, Hp), lambda i, f: (f, 0)),   # w2 ffn tile
            pl.BlockSpec((1, Hp), lambda i, f: (0, 0)),    # b2 (resident)
        ],
        out_specs=pl.BlockSpec((TM, Hp), lambda i, f: (i, 0)),
        scratch_shapes=[pltpu.VMEM((TM, Hp), jnp.float32)],
        compiler_params=pltpu.CompilerParams(
            dimension_semantics=("parallel", "arbitrary"),
            vmem_limit_bytes=vmem_limit),
    )(xp, prepared["w1"], prepared["b1"], prepared["w2"], prepared["b2"])

    return out[:M, :H].reshape(orig_shape)


# ---------------------------------------------------------------------------
# Pure-JAX reference mirroring the PyTorch forward (exact erf GELU).
# ---------------------------------------------------------------------------
def ffn_reference(x, params):
    h = x @ params["w1"] + params["b1"]
    h = jax.nn.gelu(h, approximate=False)   # torch.nn.GELU() default
    return h @ params["w2"] + params["b2"]


if __name__ == "__main__":
    batch, seq, hidden, ffn_size = 2, 8, 32, 64

    key = jax.random.PRNGKey(0)
    keys = jax.random.split(key, 5)

    def init_w(k, shape):
        return jax.random.normal(k, shape, jnp.float32) * 0.1

    params = {
        "w1": init_w(keys[0], (hidden, ffn_size)),
        "b1": init_w(keys[1], (ffn_size,)),
        "w2": init_w(keys[2], (ffn_size, hidden)),
        "b2": init_w(keys[3], (hidden,)),
    }

    x = jax.random.normal(keys[4], (batch, seq, hidden), jnp.float32)

    # Weight padding / casting happens once, outside the per-call path.
    prepared = prepare_ffn_params(params, compute_dtype=jnp.float32)

    out = feed_forward_network(x, prepared)
    out = jax.block_until_ready(out)

    ref = ffn_reference(x, params)
    assert out.shape == x.shape
    assert jnp.allclose(out, ref, atol=1e-5, rtol=1e-5), "mismatch vs reference"

    print("KERNEL_OK")
</pallas_src>

<mosaic_0001>
module attributes {stable_mosaic.version = 11 : i64} {
  func.func @ffn_kernel(%arg0: i32, %arg1: i32, %arg2: memref<8x128xf32, #tpu.memory_space<vmem>>, %arg3: memref<128x128xf32, #tpu.memory_space<vmem>>, %arg4: memref<1x128xf32, #tpu.memory_space<vmem>>, %arg5: memref<128x128xf32, #tpu.memory_space<vmem>>, %arg6: memref<1x128xf32, #tpu.memory_space<vmem>>, %arg7: memref<8x128xf32, #tpu.memory_space<vmem>>, %arg8: memref<8x128xf32, #tpu.memory_space<vmem>>) attributes {dimension_semantics = [#tpu.dimension_semantics<parallel>, #tpu.dimension_semantics<arbitrary>], iteration_bounds = array<i64: 2, 1>, scalar_prefetch = 0 : i64, scratch_operands = 1 : i64, tpu.core_type = #tpu.core_type<tc>, window_params = [{transform_indices = @transform_0, window_bounds = array<i64: 8, 128>}, {transform_indices = @transform_1, window_bounds = array<i64: 128, 128>}, {transform_indices = @transform_2, window_bounds = array<i64: 1, 128>}, {transform_indices = @transform_3, window_bounds = array<i64: 128, 128>}, {pipeline_mode = #tpu.pipeline_mode<synchronous>, transform_indices = @transform_4, window_bounds = array<i64: 1, 128>}, {transform_indices = @transform_5, window_bounds = array<i64: 8, 128>}]} {
    %c0_i32 = arith.constant 0 : i32
    %0 = arith.cmpi eq, %arg1, %c0_i32 : i32
    %1 = arith.extui %0 : i1 to i32
    %c0_i32_0 = arith.constant 0 : i32
    %2 = arith.cmpi ne, %1, %c0_i32_0 : i32
    scf.if %2 {
      %cst_30 = arith.constant 0.000000e+00 : f32
      %60 = vector.broadcast %cst_30 : f32 to vector<8x128xf32>
      %c0_31 = arith.constant 0 : index
      %c0_32 = arith.constant 0 : index
      %61 = vector.load %arg8[%c0_31, %c0_32] : memref<8x128xf32, #tpu.memory_space<vmem>>, vector<8x128xf32>
      tpu.vector_store %arg8[%c0_31, %c0_32], %60 {strides = array<i32>} : memref<8x128xf32, #tpu.memory_space<vmem>>, vector<8x128xf32>,
    } else {
    }
    %c0 = arith.constant 0 : index
    %c0_1 = arith.constant 0 : index
    %3 = vector.load %arg2[%c0, %c0_1] : memref<8x128xf32, #tpu.memory_space<vmem>>, vector<8x128xf32>
    %c0_2 = arith.constant 0 : index
    %c0_3 = arith.constant 0 : index
    %4 = vector.load %arg3[%c0_2, %c0_3] : memref<128x128xf32, #tpu.memory_space<vmem>>, vector<128x128xf32>
    %cst = arith.constant dense<0.000000e+00> : vector<8x128xf32>
    %5 = tpu.matmul %3, %4, %cst {dimension_numbers = #tpu.dot_dimension_numbers<[1], [0], [0], [1], [0, 0, 1, 1], [], []>} : vector<8x128xf32>, vector<128x128xf32>, vector<8x128xf32> -> vector<8x128xf32>
    %c0_4 = arith.constant 0 : index
    %c0_5 = arith.constant 0 : index
    %6 = vector.load %arg4[%c0_4, %c0_5] : memref<1x128xf32, #tpu.memory_space<vmem>>, vector<1x128xf32>
    %7 = vector.broadcast %6 : vector<1x128xf32> to vector<8x128xf32>
    %8 = arith.addf %5, %7 : vector<8x128xf32>
    %cst_6 = arith.constant 5.000000e-01 : f32
    %9 = vector.broadcast %cst_6 : f32 to vector<8x128xf32>
    %10 = arith.mulf %9, %8 : vector<8x128xf32>
    %cst_7 = arith.constant 0.707106769 : f32
    %11 = vector.broadcast %cst_7 : f32 to vector<8x128xf32>
    %12 = arith.mulf %8, %11 : vector<8x128xf32>
    %13 = math.absf %12 : vector<8x128xf32>
    %cst_8 = arith.constant 0.327591091 : f32
    %14 = vector.broadcast %cst_8 : f32 to vector<8x128xf32>
    %15 = arith.mulf %14, %13 : vector<8x128xf32>
    %cst_9 = arith.constant 1.000000e+00 : f32
    %16 = vector.broadcast %cst_9 : f32 to vector<8x128xf32>
    %17 = arith.addf %16, %15 : vector<8x128xf32>
    %18 = tpu.reciprocal %17 {approx = true} : vector<8x128xf32> -> vector<8x128xf32>
    %19 = arith.mulf %17, %18 : vector<8x128xf32>
    %cst_10 = arith.constant 2.000000e+00 : f32
    %20 = vector.broadcast %cst_10 : f32 to vector<8x128xf32>
    %21 = arith.subf %20, %19 : vector<8x128xf32>
    %22 = arith.mulf %18, %21 : vector<8x128xf32>
    %cst_11 = arith.constant 1.06140542 : f32
    %23 = vector.broadcast %cst_11 : f32 to vector<8x128xf32>
    %24 = arith.mulf %22, %23 : vector<8x128xf32>
    %cst_12 = arith.constant -1.45315206 : f32
    %25 = vector.broadcast %cst_12 : f32 to vector<8x128xf32>
    %26 = arith.addf %25, %24 : vector<8x128xf32>
    %27 = arith.mulf %22, %26 : vector<8x128xf32>
    %cst_13 = arith.constant 1.42141378 : f32
    %28 = vector.broadcast %cst_13 : f32 to vector<8x128xf32>
    %29 = arith.addf %28, %27 : vector<8x128xf32>
    %30 = arith.mulf %22, %29 : vector<8x128xf32>
    %cst_14 = arith.constant -0.284496725 : f32
    %31 = vector.broadcast %cst_14 : f32 to vector<8x128xf32>
    %32 = arith.addf %31, %30 : vector<8x128xf32>
    %33 = arith.mulf %22, %32 : vector<8x128xf32>
    %cst_15 = arith.constant 0.254829586 : f32
    %34 = vector.broadcast %cst_15 : f32 to vector<8x128xf32>
    %35 = arith.addf %34, %33 : vector<8x128xf32>
    %36 = arith.mulf %22, %35 : vector<8x128xf32>
    %cst_16 = arith.constant 0.000000e+00 : f32
    %37 = vector.broadcast %cst_16 : f32 to vector<8x128xf32>
    %38 = arith.subf %37, %13 : vector<8x128xf32>
    %39 = arith.mulf %38, %13 : vector<8x128xf32>
    %40 = math.exp %39 : vector<8x128xf32>
    %41 = arith.mulf %36, %40 : vector<8x128xf32>
    %cst_17 = arith.constant 1.000000e+00 : f32
    %42 = vector.broadcast %cst_17 : f32 to vector<8x128xf32>
    %43 = arith.subf %42, %41 : vector<8x128xf32>
    %cst_18 = arith.constant 0.000000e+00 : f32
    %44 = vector.broadcast %cst_18 : f32 to vector<8x128xf32>
    %45 = arith.cmpf olt, %12, %44 : vector<8x128xf32>
    %cst_19 = arith.constant 0.000000e+00 : f32
    %46 = vector.broadcast %cst_19 : f32 to vector<8x128xf32>
    %47 = arith.subf %46, %43 : vector<8x128xf32>
    %48 = arith.select %45, %47, %43 : vector<8x128xi1>, vector<8x128xf32>
    %cst_20 = arith.constant 1.000000e+00 : f32
    %49 = vector.broadcast %cst_20 : f32 to vector<8x128xf32>
    %50 = arith.addf %49, %48 : vector<8x128xf32>
    %51 = arith.mulf %10, %50 : vector<8x128xf32>
    %c0_21 = arith.constant 0 : index
    %c0_22 = arith.constant 0 : index
    %52 = vector.load %arg8[%c0_21, %c0_22] : memref<8x128xf32, #tpu.memory_space<vmem>>, vector<8x128xf32>
    %c0_23 = arith.constant 0 : index
    %c0_24 = arith.constant 0 : index
    %53 = vector.load %arg5[%c0_23, %c0_24] : memref<128x128xf32, #tpu.memory_space<vmem>>, vector<128x128xf32>
    %cst_25 = arith.constant dense<0.000000e+00> : vector<8x128xf32>
    %54 = tpu.matmul %51, %53, %cst_25 {dimension_numbers = #tpu.dot_dimension_numbers<[1], [0], [0], [1], [0, 0, 1, 1], [], []>} : vector<8x128xf32>, vector<128x128xf32>, vector<8x128xf32> -> vector<8x128xf32>
    %55 = arith.addf %52, %54 : vector<8x128xf32>
    %c0_26 = arith.constant 0 : index
    %c0_27 = arith.constant 0 : index
    %56 = vector.load %arg8[%c0_26, %c0_27] : memref<8x128xf32, #tpu.memory_space<vmem>>, vector<8x128xf32>
    tpu.vector_store %arg8[%c0_26, %c0_27], %55 {strides = array<i32>} : memref<8x128xf32, #tpu.memory_space<vmem>>, vector<8x128xf32>,
    %c0_i32_28 = arith.constant 0 : i32
    %57 = arith.cmpi eq, %arg1, %c0_i32_28 : i32
    %58 = arith.extui %57 : i1 to i32
    %c0_i32_29 = arith.constant 0 : i32
    %59 = arith.cmpi ne, %58, %c0_i32_29 : i32
    scf.if %59 {
      %c0_30 = arith.constant 0 : index
      %c0_31 = arith.constant 0 : index
      %60 = vector.load %arg8[%c0_30, %c0_31] : memref<8x128xf32, #tpu.memory_space<vmem>>, vector<8x128xf32>
      %c0_32 = arith.constant 0 : index
      %c0_33 = arith.constant 0 : index
      %61 = vector.load %arg6[%c0_32, %c0_33] : memref<1x128xf32, #tpu.memory_space<vmem>>, vector<1x128xf32>
      %62 = vector.broadcast %61 : vector<1x128xf32> to vector<8x128xf32>
      %63 = arith.addf %60, %62 : vector<8x128xf32>
      %c0_34 = arith.constant 0 : index
      %c0_35 = arith.constant 0 : index
      %64 = vector.load %arg7[%c0_34, %c0_35] : memref<8x128xf32, #tpu.memory_space<vmem>>, vector<8x128xf32>
      tpu.vector_store %arg7[%c0_34, %c0_35], %63 {strides = array<i32>} : memref<8x128xf32, #tpu.memory_space<vmem>>, vector<8x128xf32>,
    } else {
    }
    return
  }
  func.func @transform_0(%arg0: i32, %arg1: i32) -> (i32, i32) {
    %c0_i32 = arith.constant 0 : i32
    %c0_i32_0 = arith.constant 0 : i32
    return %arg0, %c0_i32 : i32, i32
  }
  func.func @transform_1(%arg0: i32, %arg1: i32) -> (i32, i32) {
    %c0_i32 = arith.constant 0 : i32
    %c0_i32_0 = arith.constant 0 : i32
    return %c0_i32, %arg1 : i32, i32
  }
  func.func @transform_2(%arg0: i32, %arg1: i32) -> (i32, i32) {
    %c0_i32 = arith.constant 0 : i32
    %c0_i32_0 = arith.constant 0 : i32
    return %c0_i32, %arg1 : i32, i32
  }
  func.func @transform_3(%arg0: i32, %arg1: i32) -> (i32, i32) {
    %c0_i32 = arith.constant 0 : i32
    %c0_i32_0 = arith.constant 0 : i32
    return %arg1, %c0_i32 : i32, i32
  }
  func.func @transform_4(%arg0: i32, %arg1: i32) -> (i32, i32) {
    %c0_i32 = arith.constant 0 : i32
    %c0_i32_0 = arith.constant 0 : i32
    %c0_i32_1 = arith.constant 0 : i32
    return %c0_i32, %c0_i32_0 : i32, i32
  }
  func.func @transform_5(%arg0: i32, %arg1: i32) -> (i32, i32) {
    %c0_i32 = arith.constant 0 : i32
    %c0_i32_0 = arith.constant 0 : i32
    return %arg0, %c0_i32 : i32, i32
  }
}

</mosaic_0001>

<bundles_post_ra>
// kernel: tpu_custom_call.1
= control target key start
LH: loop header
LB: loop body
LE: loop exit
PB: predicated region body
PF: predicated region fallthrough
CT: control target
= control target key end

     0   :  { %10 = vsyncpa [#allocation4], 0  ;;  %s1424_s0 = inlined_call_operand.hbm [shape: f32[16,128], index: 0, kind: input, shape index: {}]   ;;  %s1425_s1 = inlined_call_operand.hbm [shape: f32[128,128], index: 1, kind: input, shape index: {}]   ;;  %s1426_s2 = inlined_call_operand.vmem [shape: f32[1,128], index: 2, kind: input, shape index: {}]   ;;  %s1427_s3 = inlined_call_operand.hbm [shape: f32[128,128], index: 3, kind: input, shape index: {}]   ;;  %s1428_s4 = inlined_call_operand.vmem [shape: f32[1,128], index: 4, kind: input, shape index: {}]   ;;  %s1429_s5 = inlined_call_operand.hbm [shape: f32[16,128], index: 5, kind: output, shape index: {}]  }
   0x1   :  { %12 = vsyncpa [#allocation4 + $0x1], 0 }
   0x2   :  { %13 = vsyncpa [#allocation7], 0 }
   0x3   :  { %14 = vsyncpa [#allocation5], 0 }
   0x4   :  { %16 = vsyncpa [#allocation5 + $0x1], 0  ;;  %s1145_s18 = smov 0   ;;  %s1147_s19 = smov 0  }
   0x5   :  { %s1149_s20 = smov 0   ;;  %s1151_s21 = smov 0  }
   0x6   :  { %s1153_s22 = smov 0   ;;  %s1155_s23 = smov 0  }
   0x7 LB: > { %s668_s24 = sadd.s32 4294967295, %s1104_s23   ;;  %s669_s25 = sadd.s32 4294967294, %s1104_s23   ;;  %s1104_s23 = sphi %s1155_s23, %s22_s23   ;;  %s1100_s22 = sphi %s1153_s22, %s1451_s22   ;;  %s1096_s21 = sphi %s1151_s21, %s1450_s21   ;;  %s1092_s20 = sphi %s1149_s20, %s1449_s20   ;;  %s1088_s19 = sphi %s1147_s19, %s1448_s19   ;;  %s1084_s18 = sphi %s1145_s18, %s1447_s18  }
   0x8   : > { %p54_p0 = scmp.ne.s32.totalorder %s1088_s19, %s1084_s18  ;;  %p1179_p1 = scmp.eq.s32.totalorder %s668_s24, 0 }
   0x9   : > { %p1183_p2 = scmp.eq.s32.totalorder %s668_s24, 1  ;;  %p183_p3 = scmp.eq.s32.totalorder %s669_s25, 1 }
   0xa   : > { %s1434_s26 = scalar_select %p1179_p1, 1, 0 }
   0xb   : > { %p1189_p4 = por %p1179_p1, %p54_p0  ;;  %p670_p5 = scmp.ge.s32.totalorder %s1104_s23, 1 }
   0xc   : > { %p1194_p6 = por %p183_p3, %p54_p0  ;;  %p190_p7 = scmp.lt.s32.totalorder %s1104_s23, 3 }
   0xd   : > { %s1436_s28 = scalar_select %p1189_p4, 1, 0 }
   0xe   : > { %s1437_s29 = scalar_select %p1194_p6, 1, 0 }
   0xf   : > { %p1199_p8 = pnand %p670_p5, %p190_p7  ;;  %s1106_s6 = smov [#allocation6]  }
  0x10   : > { %s204_s7 = sshll.u32 %s1106_s6, 4  ;;  %s1107_s9 = smov [#allocation8]   ;;  %s1203_s7 = int_to_ptr.vmem [resolvable:$true] %s204_s7 }
  0x11   : > { %p852_p9 = pneg %p1199_p8  ;;  %s226_s10 = sshll.u32 %s1107_s9, 4  ;;  %s1214_s10 = int_to_ptr.vmem [resolvable:$true] %s226_s10 }
  0x12   : > { %s932_s13 = scalar_lea.hbm %s1425_s1, 2048 }
  0x13   : > { %p1210_p11 = pnand %p852_p9, %p1179_p1  ;;  %p933_p12 = scmp.ne.s32.totalorder %s1425_s1, %s932_s13 }
  0x14   : > { %p939_p5 = scmp.lt.u32.totalorder %s932_s13, %s1425_s1 }
  0x15   : > { %p934_p13 = pneg %p1210_p11 }
  0x17   : > { %p935_p0 = pnand %p934_p13, %p933_p12 }
  0x19   : > { %p936_p3 = pneg %p935_p0 }
  0x1b   : > { %p941_p7 = pnand %p939_p5, %p936_p3 }
  0x1d   : > { %944 = shalt.err (!%p941_p7)
}
  0x1e   : > { %s945_s24 = scalar_lea.vmem %s1203_s7, 2048  ;;  %p953_p1 = scmp.lt.s32.totalorder %s1203_s7, %s1203_s7 }
  0x1f   : > { %p946_p9 = scmp.ne.s32.totalorder %s1203_s7, %s945_s24  ;;  %p954_p12 = scmp.lt.s32.totalorder %s945_s24, %s945_s24 }
  0x21   : > { %p948_p10 = pnand %p946_p9, %p934_p13  ;;  %p955_p0 = por %p954_p12, %p953_p1 }
  0x23   : > { %p949_p6 = pneg %p948_p10 }
  0x25   : > { %p956_p4 = pnand %p955_p0, %p949_p6 }
  0x27   : > { %959 = shalt.err (!%p956_p4)
}
  0x28   : > { %s1108_s25 = smov 128   ;;  %s1109_s6 = smov 8  }
  0x29   : > { %855 = dma.hbm_to_vmem [thread:$0]  (!%p1210_p11), %s1425_s1, 2048, %s1203_s7, [#allocation7], %s1108_s25, %s1108_s25, %s1109_s6  }
  0x2a   : > { %s960_s14 = scalar_lea.hbm %s1427_s3, 2048 }
  0x2b   : > { %p961_p1 = scmp.ne.s32.totalorder %s1427_s3, %s960_s14  ;;  %p967_p10 = scmp.lt.u32.totalorder %s960_s14, %s1427_s3 }
  0x2d   : > { %p963_p4 = pnand %p961_p1, %p934_p13 }
  0x2f   : > { %p964_p6 = pneg %p963_p4 }
  0x31   : > { %p969_p3 = pnand %p967_p10, %p964_p6 }
  0x33   : > { %972 = shalt.err (!%p969_p3)
}
  0x34   : > { %s973_s7 = scalar_lea.vmem %s1214_s10, 2048  ;;  %p981_p12 = scmp.lt.s32.totalorder %s1214_s10, %s1214_s10 }
  0x35   : > { %p974_p5 = scmp.ne.s32.totalorder %s1214_s10, %s973_s7  ;;  %p982_p0 = scmp.lt.s32.totalorder %s973_s7, %s973_s7 }
  0x37   : > { %p976_p7 = pnand %p974_p5, %p934_p13  ;;  %p983_p1 = por %p982_p0, %p981_p12 }
  0x39   : > { %p977_p9 = pneg %p976_p7 }
  0x3b   : > { %p984_p4 = pnand %p983_p1, %p977_p9 }
  0x3d   : > { %987 = shalt.err (!%p984_p4)
}
  0x3e   : > { %858 = dma.hbm_to_vmem [thread:$0]  (!%p1210_p11), %s1427_s3, 2048, %s1214_s10, [#allocation7], %s1108_s25, %s1108_s25, %s1109_s6  }
  0x3f   : > { %s34_s12 = sadd.s32 1, %s1100_s22  ;;  %s41_s13 = sadd.s32 1, %s1092_s20 }
  0x40   : > { %p36_p13 = scmp.ge.s32.totalorder %s34_s12, 2  ;;  %p48_p6 = scmp.ne.s32.totalorder %s1092_s20, %s1088_s19 }
  0x41   : > { %p49_p10 = scmp.eq.s32.totalorder %s1104_s23, 0  ;;  %p869_p3 = scmp.lt.s32.totalorder %s1104_s23, 2 }
  0x42   : > { %s1453_s12 = smov (%p36_p13, %s34_s12), 0  ;;  %p1278_p7 = por %p1183_p2, %p48_p6 }
  0x43   : > { %p50_p5 = por %p49_p10, %p48_p6  ;;  %s38_s14 = ssub.s32 %s1100_s22, %s1453_s12 }
  0x44   : > { %s1440_s8 = scalar_select %p1278_p7, 1, 0 }
  0x45   : > { %s243_s15 = sand.u32 1, %s1092_s20   ;;  %p39_p9 = scmp.eq.s32.totalorder %s38_s14, 0 }
  0x46   : > { %s675_s10 = sshll.u32 %s243_s15, 3  ;;  %s676_s25 = sshll.u32 %s1100_s22, 7 }
  0x47   : > { %s1287_s6 = scalar_select %p39_p9, %s1092_s20, %s41_s13  }
  0x48   : > { %s1292_s24 = scalar_lea.hbm %s1424_s0, %s676_s25  ;;  %s247_s27 = scalar_lea.vmem [#allocation3], %s675_s10 }
  0x49   : > { %s254_s7 = sshll.u32 %s247_s27, 4  ;;  %p1296_p2 = pnand %p869_p3, %p50_p5  ;;  %s1300_s7 = int_to_ptr.vmem [resolvable:$true] %s254_s7 }
  0x4a   : > { %s244_s11 = scalar_lea.sflag [#allocation4], %s243_s15  ;;  %s988_s13 = scalar_lea.hbm %s1292_s24, 128 }
  0x4b   : > { %p989_p11 = scmp.ne.s32.totalorder %s1292_s24, %s988_s13  ;;  %p990_p12 = pneg %p1296_p2 }
  0x4c   : > { %s993_s25 = scalar_lea.hbm %s1424_s0, 256  ;;  %p994_p4 = scmp.lt.u32.totalorder %s1292_s24, %s1424_s0 }
  0x4d   : > { %p991_p0 = pnand %p990_p12, %p989_p11  ;;  %p995_p13 = scmp.lt.u32.totalorder %s993_s25, %s988_s13 }
  0x4e   : > { %p997_p10 = scmp.lt.u32.totalorder %s988_s13, %s1292_s24 }
  0x4f   : > { %p992_p1 = pneg %p991_p0  ;;  %p996_p6 = por %p995_p13, %p994_p4 }
  0x51   : > { %p998_p3 = por %p997_p10, %p996_p6 }
  0x53   : > { %p999_p5 = pnand %p998_p3, %p992_p1 }
  0x55   : > { %1002 = shalt.err (!%p999_p5)
}
  0x56   : > { %s1003_s15 = scalar_lea.vmem %s1300_s7, 128  ;;  %s1110_s27 = smov [#allocation3]  }
  0x57   : > { %p1004_p9 = scmp.ne.s32.totalorder %s1300_s7, %s1003_s15  ;;  %s1008_s14 = sshll.u32 %s1110_s27, 4  ;;  %s1009_s14 = int_to_ptr.vmem [resolvable:$false] %s1008_s14 }
  0x58   : > { %s1010_s10 = scalar_lea.vmem %s1009_s14, 256  ;;  %p1011_p7 = scmp.lt.s32.totalorder %s1300_s7, %s1009_s14 }
  0x59   : > { %p1006_p11 = pnand %p1004_p9, %p990_p12  ;;  %p1012_p4 = scmp.lt.s32.totalorder %s1010_s10, %s1003_s15 }
  0x5b   : > { %p1007_p0 = pneg %p1006_p11  ;;  %p1013_p13 = por %p1012_p4, %p1011_p7 }
  0x5d   : > { %p1014_p6 = pnand %p1013_p13, %p1007_p0 }
  0x5f   : > { %1017 = shalt.err (!%p1014_p6)
}
  0x60   : > { %862 = dma.hbm_to_vmem [thread:$0]  (!%p1296_p2), %s1292_s24, 128, %s1300_s7, %s244_s11  }
  0x61   : > { %263 = sbr.rel (%p1199_p8) target bundleno = 639 (0x27f), region = 40  ;;  %s1330_s13 = sand.u32 (!%p1199_p8), 1, %s1088_s19  }
  0x62   : > { %s678_s25 = sshll.u32 (!%p1199_p8), %s1330_s13, 3  ;;  %s266_s16 = scalar_lea.sflag (!%p1199_p8), [#allocation4], %s1330_s13 }
  0x63   : > { %s1336_s17 = scalar_lea.vmem (!%p1199_p8), [#allocation3], %s678_s25  ;;  %p1442_p7 = scmp.ne.s32.totalorder (!%p1199_p8), %s1436_s28, 0 }
  0x68   : > { %1071 = dma.done.wait (%p1442_p7), %s266_s16, 128  }
  0x69   : > { %1073 = vsyncadd (%p1442_p7), %s266_s16, 4294967168  ;;  %p1443_p2 = scmp.ne.s32.totalorder %s1434_s26, 0 }
  0x6b   : > { %1075 = dma.done.wait (%p1443_p2), [#allocation7], 4096  }
  0x6c   : > { %1077 = vsyncadd (%p1443_p2), [#allocation7], 4294963200  ;;  %v1111_v0 = vmov 0.0|0.0   ;;  %vm1112_vm0 = vmmov 0   ;;  %v1113_v1 = vmov 0.0   ;;  %v317_v2 = vld [vmem:[#allocation6] sm:$0xff] }
  0x6d   : > { %792 = vmatprep.subr.bf16.mxu0 %v1111_v0  ;;  %754 = vmatprep.mubr.msk.f32.mxu0 %vm1112_vm0, %v1113_v1  ;;  %v318_v3 = vld [vmem:[#allocation6 + $0x8] sm:$0xff]  ;;  %v319_v4 = vld [vmem:[#allocation6 + $0x10] sm:$0xff]  ;;  %v320_v6 = vld [vmem:[#allocation6 + $0x18] sm:$0xff]  ;;  %s685_s7 = sshll.u32 %s1096_s21, 7  ;;  %s306_s9 = scalar_lea.vmem [#allocation9], %s678_s25 }
  0x6e   : > { %816 = vmatprep.subr.bf16.mxu1 %v1111_v0  ;;  %789 = vmatprep.mubr.msk.f32.mxu1 %vm1112_vm0, %v1113_v1  ;;  %v793_v5 = vpack.c.bf16 %v318_v3, %v317_v2  ;;  %v796_v7 = vpack.c.bf16 %v320_v6, %v319_v4  ;;  %v321_v8 = vld [vmem:[#allocation6 + $0x20] sm:$0xff]  ;;  %v322_v9 = vld [vmem:[#allocation6 + $0x28] sm:$0xff]  ;;  %v323_v11 = vld [vmem:[#allocation6 + $0x30] sm:$0xff]  ;;  %s555_s11 = sshll.u32 %s306_s9, 4  ;;  %s1375_s14 = scalar_lea.hbm %s1429_s5, %s685_s7  ;;  %s1377_s11 = int_to_ptr.vmem [resolvable:$true] %s555_s11 }
  0x6f   : > { %v799_v10 = vpack.c.bf16 %v322_v9, %v321_v8  ;;  %v324_v12 = vld [vmem:[#allocation6 + $0x38] sm:$0xff]  ;;  %v325_v14 = vld [vmem:[#allocation6 + $0x40] sm:$0xff]  ;;  %v326_v15 = vld [vmem:[#allocation6 + $0x48] sm:$0xff]  ;;  %s542_s10 = scalar_lea.sflag [#allocation5], %s1330_s13  ;;  %s1018_s16 = scalar_lea.vmem %s1377_s11, 128 }
  0x70   : > { %794 = vmatpush3.bf16.msra.mxu0 %v793_v5  ;;  %v802_v13 = vpack.c.bf16 %v324_v12, %v323_v11  ;;  %v805_v16 = vpack.c.bf16 %v326_v15, %v325_v14  ;;  %v327_v17 = vld [vmem:[#allocation6 + $0x50] sm:$0xff]  ;;  %v328_v18 = vld [vmem:[#allocation6 + $0x58] sm:$0xff]  ;;  %v329_v20 = vld [vmem:[#allocation6 + $0x60] sm:$0xff]  ;;  %p1019_p8 = scmp.ne.s32.totalorder %s1377_s11, %s1018_s16  ;;  %p1444_p12 = scmp.ne.s32.totalorder %s1440_s8, 0 }
  0x71   : > { %795 = vmatprep.subr.bf16.mxu0 %v1111_v0  ;;  %v808_v19 = vpack.c.bf16 %v328_v18, %v327_v17  ;;  %v330_v21 = vld [vmem:[#allocation6 + $0x68] sm:$0xff]  ;;  %v331_v23 = vld [vmem:[#allocation6 + $0x70] sm:$0xff]  ;;  %v332_v24 = vld [vmem:[#allocation6 + $0x78] sm:$0xff]  ;;  %s1114_s21 = smov [#allocation9]  }
  0x72   : > { %v811_v22 = vpack.c.bf16 %v330_v21, %v329_v20  ;;  %v814_v25 = vpack.c.bf16 %v332_v24, %v331_v23  ;;  %v316_v26 = vld [vmem:[%s1336_s17] sm:$0xff]  ;;  %v440_v27 = vld [vmem:[#allocation8] sm:$0xff]  ;;  %v441_v28 = vld [vmem:[#allocation8 + $0x8] sm:$0xff]  ;;  %p1020_p1 = pnand %p1019_p8, %p1444_p12  ;;  %s1022_s25 = sshll.u32 %s1114_s21, 4  ;;  %s1023_s25 = int_to_ptr.vmem [resolvable:$false] %s1022_s25 }
  0x73   : > { %v817_v29 = vpack.c.bf16 %v441_v28, %v440_v27  ;;  %v442_v30 = vld [vmem:[#allocation8 + $0x10] sm:$0xff]  ;;  %v443_v31 = vld [vmem:[#allocation8 + $0x18] sm:$0xff]  ;;  %v444_v33 = vld [vmem:[#allocation8 + $0x20] sm:$0xff]  ;;  %s1024_s17 = scalar_lea.vmem %s1023_s25, 256  ;;  %p1025_p3 = scmp.lt.s32.totalorder %s1377_s11, %s1023_s25 }
  0x74   : > { %797 = vmatpush3.bf16.msra.mxu0 %v796_v7  ;;  %v820_v32 = vpack.c.bf16 %v443_v31, %v442_v30  ;;  %v445_v34 = vld [vmem:[#allocation8 + $0x28] sm:$0xff]  ;;  %v446_v36 = vld [vmem:[#allocation8 + $0x30] sm:$0xff]  ;;  %v447_v37 = vld [vmem:[#allocation8 + $0x38] sm:$0xff]  ;;  %p1021_p10 = pneg %p1020_p1  ;;  %p1026_p5 = scmp.lt.s32.totalorder %s1024_s17, %s1018_s16 }
  0x75   : > { %798 = vmatprep.subr.bf16.mxu0 %v1111_v0  ;;  %818 = vmatpush3.bf16.msra.mxu1 %v817_v29  ;;  %v823_v35 = vpack.c.bf16 %v445_v34, %v444_v33  ;;  %v826_v38 = vpack.c.bf16 %v447_v37, %v446_v36  ;;  %v448_v39 = vld [vmem:[#allocation8 + $0x40] sm:$0xff]  ;;  %v449_v40 = vld [vmem:[#allocation8 + $0x48] sm:$0xff]  ;;  %v450_v42 = vld [vmem:[#allocation8 + $0x50] sm:$0xff] }
  0x76   : > { %819 = vmatprep.subr.bf16.mxu1 %v1111_v0  ;;  %v829_v41 = vpack.c.bf16 %v449_v40, %v448_v39  ;;  %v451_v43 = vld [vmem:[#allocation8 + $0x58] sm:$0xff]  ;;  %v452_v45 = vld [vmem:[#allocation8 + $0x60] sm:$0xff]  ;;  %v453_v46 = vld [vmem:[#allocation8 + $0x68] sm:$0xff]  ;;  %p1027_p9 = por %p1026_p5, %p1025_p3 }
  0x77   : > { %v832_v44 = vpack.c.bf16 %v451_v43, %v450_v42  ;;  %v835_v47 = vpack.c.bf16 %v453_v46, %v452_v45  ;;  %v454_v48 = vld [vmem:[#allocation8 + $0x70] sm:$0xff]  ;;  %v455_v49 = vld [vmem:[#allocation8 + $0x78] sm:$0xff] }
  0x78   : > { %800 = vmatpush3.bf16.msra.mxu0 %v799_v10  ;;  %v838_v50 = vpack.c.bf16 %v455_v49, %v454_v48  ;;  %v682_v51 = vld [vmem:[%s1426_s2] ss:$0 sm:$0xff]  ;;  %p1028_p11 = pnand %p1027_p9, %p1021_p10 }
  0x79   : > { %801 = vmatprep.subr.bf16.mxu0 %v1111_v0  ;;  %821 = vmatpush3.bf16.msra.mxu1 %v820_v32 }
  0x7a   : > { %822 = vmatprep.subr.bf16.mxu1 %v1111_v0 }
  0x7c   : > { %803 = vmatpush3.bf16.msra.mxu0 %v802_v13 }
  0x7d   : > { %804 = vmatprep.subr.bf16.mxu0 %v1111_v0  ;;  %824 = vmatpush3.bf16.msra.mxu1 %v823_v35 }
  0x7e   : > { %825 = vmatprep.subr.bf16.mxu1 %v1111_v0 }
  0x80   : > { %806 = vmatpush3.bf16.msra.mxu0 %v805_v16 }
  0x81   : > { %807 = vmatprep.subr.bf16.mxu0 %v1111_v0  ;;  %827 = vmatpush3.bf16.msra.mxu1 %v826_v38 }
  0x82   : > { %828 = vmatprep.subr.bf16.mxu1 %v1111_v0 }
  0x84   : > { %809 = vmatpush3.bf16.msra.mxu0 %v808_v19  ;;  %v683_v19 = vld [vmem:[%s1428_s4] ss:$0 sm:$0xff] }
  0x85   : > { %810 = vmatprep.subr.bf16.mxu0 %v1111_v0  ;;  %830 = vmatpush3.bf16.msra.mxu1 %v829_v41 }
  0x86   : > { %831 = vmatprep.subr.bf16.mxu1 %v1111_v0 }
  0x88   : > { %812 = vmatpush3.bf16.msra.mxu0 %v811_v22 }
  0x89   : > { %813 = vmatprep.subr.bf16.mxu0 %v1111_v0  ;;  %833 = vmatpush3.bf16.msra.mxu1 %v832_v44 }
  0x8a   : > { %834 = vmatprep.subr.bf16.mxu1 %v1111_v0 }
  0x8c   : > { %815 = vmatpush3.bf16.msra.mxu0 %v814_v25 }
  0x8d   : > { %836 = vmatpush3.bf16.msra.mxu1 %v835_v47 }
  0x8e   : > { %837 = vmatprep.subr.bf16.mxu1 %v1111_v0 }
  0x8f   : > { %755 = vmatmul.mubr.f32.vlgmr.msra.gmra.mrb[0].mxu0 %v316_v26 }
  0x91   : > { %839 = vmatpush3.bf16.msra.mxu1 %v838_v50 }
 0x162   : > { %v406_v52 = vpop.f32.mrb[0].mxu0 }
 0x163   : > { %v407_v53 = vadd.f32 %v682_v51, %v406_v52  ;;  %v756_v54 = vpop.f32.mrb[1].mxu0 }
 0x165   : > { %v411_v55 = vmul.f32 0.70710677, %v407_v53  ;;  %v410_v16 = vmul.f32 0.5, %v407_v53 }
 0x167   : > { %v412_v56 = vand.u32 2147483647, %v411_v55  ;;  %vm434_vm1 = vcmp.lt.f32.partialorder %v411_v55, 0.0 }
 0x169   : > { %v413_v57 = vmul.f32 0.3275911, %v412_v56  ;;  %v428_v61 = vsub.f32 0.0, %v412_v56 }
 0x16b   : > { %v414_v58 = vadd.f32 1.0, %v413_v57  ;;  %v429_v1 = vmul.f32 %v428_v61, %v412_v56 }
 0x16d   : > { %928 = vrcp.f32 %v414_v58  ;;  %v430_v3 = vmul.f32 1.442695, %v429_v1 }
 0x16f   : > { %930 = vpow2.f32 %v430_v3 }
 0x177   : > { %v929_v59 = vpop.eup %928 }
 0x178   : > { %v416_v60 = vmul.f32 %v929_v59, %v414_v58 }
 0x179   : > { %v931_v11 = vpop.eup %930 }
 0x17a   : > { %v417_v62 = vsub.f32 2.0, %v416_v60 }
 0x17c   : > { %v418_v63 = vmul.f32 %v929_v59, %v417_v62 }
 0x17e   : > { %v419_v0 = vmul.f32 1.0614054, %v418_v63 }
 0x180   : > { %v420_v2 = vadd.f32 -1.4531521, %v419_v0 }
 0x182   : > { %v421_v4 = vmul.f32 %v420_v2, %v418_v63 }
 0x184   : > { %v422_v5 = vadd.f32 1.4214138, %v421_v4 }
 0x186   : > { %v423_v6 = vmul.f32 %v422_v5, %v418_v63 }
 0x188   : > { %v424_v7 = vadd.f32 -0.28449672, %v423_v6 }
 0x18a   : > { %v425_v8 = vmul.f32 %v424_v7, %v418_v63 }
 0x18c   : > { %v426_v9 = vadd.f32 0.2548296, %v425_v8 }
 0x18e   : > { %v427_v10 = vmul.f32 %v426_v9, %v418_v63 }
 0x190   : > { %v432_v12 = vmul.f32 %v931_v11, %v427_v10 }
 0x192   : > { %v433_v13 = vsub.f32 1.0, %v432_v12 }
 0x194   : > { %v435_v14 = vsub.f32 0.0, %v433_v13 }
 0x196   : > { %v436_v15 = vsel %vm434_vm1, %v435_v14, %v433_v13 }
 0x197   : > { %v437_v17 = vadd.f32 1.0, %v436_v15 }
 0x199   : > { %v438_v18 = vmul.f32 %v437_v17, %v410_v16 }
 0x19b   : > { %790 = vmatmul.mubr.f32.vlgmr.msra.gmra.mrb[0].mxu1 %v438_v18 }
 0x26e   : > { %v522_v20 = vpop.f32.mrb[0].mxu1 }
 0x26f   : > { %v539_v21 = vadd.f32 %v683_v19, %v522_v20  ;;  %v791_v22 = vpop.f32.mrb[1].mxu1 }
 0x271   : > { %540 = vst [vmem:[%s306_s9] sm:$0xff] %v539_v21 }
 0x272   : > { %1031 = shalt.err (!%p1028_p11)
}
 0x273   : > { %s1032_s13 = scalar_lea.hbm %s1375_s14, 128  ;;  %s1036_s30 = scalar_lea.hbm %s1429_s5, 256 }
 0x274   : > { %p1033_p0 = scmp.ne.s32.totalorder %s1375_s14, %s1032_s13  ;;  %p1037_p6 = scmp.lt.u32.totalorder %s1375_s14, %s1429_s5 }
 0x275   : > { %p1038_p7 = scmp.lt.u32.totalorder %s1036_s30, %s1032_s13  ;;  %p1040_p8 = scmp.lt.u32.totalorder %s1032_s13, %s1375_s14 }
 0x276   : > { %p1034_p4 = pnand %p1033_p0, %p1444_p12 }
 0x277   : > { %p1039_p2 = por %p1038_p7, %p1037_p6 }
 0x278   : > { %p1035_p13 = pneg %p1034_p4 }
 0x279   : > { %p1041_p1 = por %p1040_p8, %p1039_p2 }
 0x27b   : > { %p1042_p10 = pnand %p1041_p1, %p1035_p13 }
 0x27d   : > { %1045 = shalt.err (!%p1042_p10)
}
 0x27e   : > { %850 = dma.vmem_to_hbm [thread:$0]  (%p1444_p12), %s1377_s11, 128, %s1375_s14, %s542_s10  }
 0x27f PF: > { %s567_s9 = sand.u32 1, %s1084_s18   ;;  %p1445_p3 = scmp.ne.s32.totalorder %s1437_s29, 0 }
 0x280   : > { %p1446_p5 = scmp.ge.s32.totalorder %s1104_s23, 2  ;;  %s568_s15 = scalar_lea.sflag [#allocation5], %s567_s9 }
 0x282   : > { %p864_p9 = pnand %p1446_p5, %p1445_p3 }
 0x284   : > { %1079 = dma.done.wait (!%p864_p9), %s568_s15, 128  }
 0x285   : > { %1081 = vsyncadd (!%p864_p9), %s568_s15, 4294967168  ;;  %s22_s23 = sadd.s32 1, %s1104_s23   ;;  %s1447_s18 = smov %s1088_s19 }
 0x286   : > { %p19_p11 = scmp.ge.s32.totalorder %s22_s23, 4   ;;  %s1448_s19 = smov %s1092_s20 }
 0x287   : > { %s1449_s20 = smov %s1287_s6  ;;  %s1450_s21 = smov %s1100_s22 }
 0x288   : > { %s1451_s22 = smov %s1453_s12  ;;  %21 = sbr.rel (!%p19_p11) target bundleno = 7 (0x7), region = 106 }
 0x28f   :  { %573 = vsyncpa [#allocation4], 1 }
 0x290   :  { %575 = vsyncpa [#allocation4 + $0x1], 1 }
 0x291   :  { %576 = vsyncpa [#allocation7], 1 }
 0x292   :  { %577 = vsyncpa [#allocation5], 1 }
 0x293   :  { %579 = vsyncpa [#allocation5 + $0x1], 1 }

</bundles_post_ra>
